<compile_context>
chip_gen: v7x
topology: tpu7x:2x2x1
jax: 0.10.0
libtpu: 0.0.40
codegen_flags: <defaults>
</compile_context>

<pallas_src>
import jax
import jax.numpy as jnp
import numpy as np
from jax import lax
from jax.experimental import pallas as pl
from jax.experimental.pallas import tpu as pltpu

LANE = 128
NEG_INF = -1e9


def _round_up(x, m):
    return ((x + m - 1) // m) * m


def _vmem_spec():
    return pl.BlockSpec(memory_space=pltpu.MemorySpace.VMEM)


# -----------------------------------------------------------------------------
# Pallas kernels
# -----------------------------------------------------------------------------
def make_input_proj_kernel(n_parts):
    """gx = sum_k x_k @ W_k + b, split into forward / backward gate halves."""

    def kernel(*refs):
        xs = refs[:n_parts]
        ws = refs[n_parts:2 * n_parts]
        b_ref = refs[2 * n_parts]
        of_ref, ob_ref = refs[2 * n_parts + 1], refs[2 * n_parts + 2]
        G = of_ref.shape[1]
        acc = jnp.dot(xs[0][...], ws[0][...], preferred_element_type=jnp.float32)
        for k in range(1, n_parts):
            acc = acc + jnp.dot(xs[k][...], ws[k][...],
                                preferred_element_type=jnp.float32)
        acc = acc + b_ref[...]
        of_ref[...] = acc[:, :G]         # forward-direction gates
        ob_ref[...] = acc[:, G:]         # backward-direction gates

    return kernel


def bilstm_rec_kernel(gxf_ref, gxb_ref, whh_f_ref, whh_b_ref, out_f_ref, out_b_ref):
    """Fused bi-directional LSTM recurrence.

    gxf_ref / gxb_ref: (S, B, G)   hoisted input-gate projections (G = 4*Hh_p)
    whh_*_ref:         (Hh_p, G)   recurrent weights (pre-transposed, padded)
    out_*_ref:         (S, B, Hh_p)
    """
    S, B, G = gxf_ref.shape
    Hh_p = whh_f_ref.shape[0]
    whh_f = whh_f_ref[...]
    whh_b = whh_b_ref[...]

    def cell(gates, c):
        # PyTorch gate order: i, f, g, o -- each gate padded to a 128-lane block.
        i_g = jax.nn.sigmoid(gates[:, 0 * Hh_p:1 * Hh_p])
        f_g = jax.nn.sigmoid(gates[:, 1 * Hh_p:2 * Hh_p])
        g_g = jnp.tanh(gates[:, 2 * Hh_p:3 * Hh_p])
        o_g = jax.nn.sigmoid(gates[:, 3 * Hh_p:4 * Hh_p])
        c_new = f_g * c + i_g * g_g
        h_new = o_g * jnp.tanh(c_new)
        return h_new, c_new

    def step(t, carry):
        h_f, c_f, h_b, c_b = carry
        t_rev = S - 1 - t
        g_f = gxf_ref[t] + jnp.dot(h_f, whh_f, preferred_element_type=jnp.float32)
        g_b = gxb_ref[t_rev] + jnp.dot(h_b, whh_b, preferred_element_type=jnp.float32)
        h_f, c_f = cell(g_f, c_f)
        h_b, c_b = cell(g_b, c_b)
        out_f_ref[t] = h_f
        out_b_ref[t_rev] = h_b
        return (h_f, c_f, h_b, c_b)

    z = jnp.zeros((B, Hh_p), jnp.float32)
    lax.fori_loop(0, S, step, (z, z, z, z), unroll=2)


def crf_fused_kernel(hf_ref, hb_ref, wtf_ref, wtb_ref, bt_ref,
                     start_ref, end_ref, trans_ref, tags_ref,
                     out_ref, em_ref):
    """Fused hidden2tag + CRF (mask = all ones).

    hf_ref/hb_ref: (S*B, Hh_p) last BiLSTM layer outputs (time-major rows t*B+b)
    wtf/wtb:       (Hh_p, Tp), bt: (1, Tp)
    start/end:     (1, Tp), trans: (Tp, Tp)   (padding = -1e9)
    tags_ref:      (S, B, 1) int32 gold tags
    out_ref:       (B, 1)  =  sum_t emissions[t, b, tag[t,b]]  -  log Z_b
    em_ref:        VMEM scratch (S*B, Tp)
    """
    S, B, _ = tags_ref.shape
    Tp = trans_ref.shape[0]

    # Fused hidden2tag: emissions for all (t, b) in one shot on the MXU.
    em = (jnp.dot(hf_ref[...], wtf_ref[...], preferred_element_type=jnp.float32)
          + jnp.dot(hb_ref[...], wtb_ref[...], preferred_element_type=jnp.float32)
          + bt_ref[...])
    em_ref[...] = em

    trans = trans_ref[...]
    tag_iota = lax.broadcasted_iota(jnp.int32, (B, Tp), 1)

    em0 = em_ref[0:B, :]                                    # (B, Tp)
    tag0 = tags_ref[0]                                      # (B, 1) int32
    gold = jnp.sum(jnp.where(tag_iota == tag0, em0, 0.0), axis=-1, keepdims=True)
    alpha = start_ref[...] + em0                            # (B, Tp)

    def step(t, carry):
        gold, alpha = carry
        row = pl.multiple_of(t * B, B)
        em_t = em_ref[pl.ds(row, B), :]                     # (B, Tp)
        tag_t = tags_ref[t]                                 # (B, 1)
        gold = gold + jnp.sum(jnp.where(tag_iota == tag_t, em_t, 0.0),
                              axis=-1, keepdims=True)
        # forward algorithm (log-sum-exp over previous tag)
        x = alpha[:, :, None] + trans[None, :, :] + em_t[:, None, :]   # (B,Tp,Tp)
        m = jnp.max(x, axis=1)                                          # (B,Tp)
        alpha = m + jnp.log(jnp.sum(jnp.exp(x - m[:, None, :]), axis=1))
        return gold, alpha

    gold, alpha = lax.fori_loop(1, S, step, (gold, alpha), unroll=2)

    fin = alpha + end_ref[...]
    m = jnp.max(fin, axis=-1, keepdims=True)
    logz = m + jnp.log(jnp.sum(jnp.exp(fin - m), axis=-1, keepdims=True))
    out_ref[...] = gold - logz


# -----------------------------------------------------------------------------
# Pallas wrappers
# -----------------------------------------------------------------------------
def lstm_input_proj(x_parts, w_parts, b):
    n = len(x_parts)
    SB = x_parts[0].shape[0]
    G = w_parts[0].shape[1] // 2
    outs = pl.pallas_call(
        make_input_proj_kernel(n),
        out_shape=(jax.ShapeDtypeStruct((SB, G), jnp.float32),
                   jax.ShapeDtypeStruct((SB, G), jnp.float32)),
        in_specs=[_vmem_spec()] * (2 * n + 1),
        out_specs=(_vmem_spec(), _vmem_spec()),
    )(*x_parts, *w_parts, b)
    return outs


def bilstm_recurrence(gxf, gxb, whh_f, whh_b):
    S, B, _ = gxf.shape
    Hh_p = whh_f.shape[0]
    return pl.pallas_call(
        bilstm_rec_kernel,
        out_shape=(jax.ShapeDtypeStruct((S, B, Hh_p), jnp.float32),
                   jax.ShapeDtypeStruct((S, B, Hh_p), jnp.float32)),
        in_specs=[_vmem_spec()] * 4,
        out_specs=(_vmem_spec(), _vmem_spec()),
    )(gxf, gxb, whh_f, whh_b)


def crf_emission_llh(hf2, hb2, wt_f, wt_b, bt, start, end, trans, tags3):
    S, B, _ = tags3.shape
    Tp = trans.shape[0]
    return pl.pallas_call(
        crf_fused_kernel,
        out_shape=jax.ShapeDtypeStruct((B, 1), jnp.float32),
        in_specs=[_vmem_spec()] * 9,
        out_specs=_vmem_spec(),
        scratch_shapes=[pltpu.VMEM((S * B, Tp), jnp.float32)],
    )(hf2, hb2, wt_f, wt_b, bt, start, end, trans, tags3)


# -----------------------------------------------------------------------------
# Forward pass (mirrors BertBiLSTMCRF.forward, loss path)
# -----------------------------------------------------------------------------
def bert_bilstm_crf_forward(padded, sentence, attention_mask=None, tags=None):
    # TODO(synk): the pretrained BERT encoder is not reproduced; a deterministic
    # embedding lookup stands in for bert_model(...).last_hidden_state.
    del attention_mask  # TODO(synk): full-length sequences assumed (CRF mask = all ones)
    B, S = sentence.shape

    emb = padded['embedding'][sentence.T]            # (S, B, Ip1), time-major
    Ip = emb.shape[-1]
    x_parts = [emb.reshape(S * B, Ip)]               # 2-D time-major activations

    for lyr in padded['lstm']:
        gxf2, gxb2 = lstm_input_proj(x_parts, lyr['w_in'], lyr['b'])
        G = gxf2.shape[1]
        hf3, hb3 = bilstm_recurrence(gxf2.reshape(S, B, G), gxb2.reshape(S, B, G),
                                     lyr['whh_f'], lyr['whh_b'])
        Hh_p = hf3.shape[-1]
        x_parts = [hf3.reshape(S * B, Hh_p), hb3.reshape(S * B, Hh_p)]
        # inter-layer LSTM dropout (p=0.1) and post-LSTM dropout are identity in eval

    if tags is None:
        # TODO(synk): CRF Viterbi decode path not implemented; only the loss path is.
        raise NotImplementedError("decode path not implemented")

    tags_t = tags.T.astype(jnp.int32)                # (S, B)
    em_llh = crf_emission_llh(x_parts[0], x_parts[1],
                              padded['wt_f'], padded['wt_b'], padded['bt'],
                              padded['start'], padded['end'], padded['trans'],
                              tags_t[:, :, None])    # (B, 1)

    # Gold-path start / transition / end scores: tiny scalar gathers in XLA.
    start_v = padded['start'][0]
    end_v = padded['end'][0]
    trans_m = padded['trans']
    path = start_v[tags_t[0]] + end_v[tags_t[-1]]
    path = path + jnp.sum(trans_m[tags_t[:-1], tags_t[1:]], axis=0)

    llh = em_llh[:, 0] + path
    return -jnp.mean(llh)


# -----------------------------------------------------------------------------
# Parameter padding to lane-dense (multiple-of-128) layouts
# -----------------------------------------------------------------------------
def pad_params(params, hidden_dim, target_size):
    Hh = hidden_dim // 2
    Hh_p = _round_up(Hh, LANE)
    G = 4 * Hh_p
    Tp = _round_up(target_size, LANE)
    Ip1 = _round_up(hidden_dim, LANE)

    gate_cols = np.concatenate([k * Hh_p + np.arange(Hh) for k in range(4)])

    def np_(x):
        return np.asarray(x, dtype=np.float32)

    out = {}
    emb = np_(params['embedding'])
    emb_p = np.zeros((emb.shape[0], Ip1), np.float32)
    emb_p[:, :hidden_dim] = emb
    out['embedding'] = jnp.asarray(emb_p)

    layers = []
    for li, layer in enumerate(params['lstm']):
        wf = np_(layer['w_ih_t_f'])      # (in_size, 4*Hh)
        wb = np_(layer['w_ih_t_b'])
        in_size = wf.shape[0]
        if li == 0:
            w_in_p = np.zeros((Ip1, 2 * G), np.float32)
            w_in_p[np.ix_(np.arange(in_size), gate_cols)] = wf
            w_in_p[np.ix_(np.arange(in_size), G + gate_cols)] = wb
            w_in = [jnp.asarray(w_in_p)]
        else:
            wpf = np.zeros((Hh_p, 2 * G), np.float32)   # rows: forward-h features
            wpb = np.zeros((Hh_p, 2 * G), np.float32)   # rows: backward-h features
            wpf[np.ix_(np.arange(Hh), gate_cols)] = wf[:Hh]
            wpf[np.ix_(np.arange(Hh), G + gate_cols)] = wb[:Hh]
            wpb[np.ix_(np.arange(Hh), gate_cols)] = wf[Hh:]
            wpb[np.ix_(np.arange(Hh), G + gate_cols)] = wb[Hh:]
            w_in = [jnp.asarray(wpf), jnp.asarray(wpb)]
        whh_f_p = np.zeros((Hh_p, G), np.float32)
        whh_b_p = np.zeros((Hh_p, G), np.float32)
        whh_f_p[np.ix_(np.arange(Hh), gate_cols)] = np_(layer['w_hh_t_f'])
        whh_b_p[np.ix_(np.arange(Hh), gate_cols)] = np_(layer['w_hh_t_b'])
        b_p = np.zeros((1, 2 * G), np.float32)
        b_p[0, gate_cols] = np_(layer['b_f'])[0]
        b_p[0, G + gate_cols] = np_(layer['b_b'])[0]
        layers.append({'w_in': w_in,
                       'whh_f': jnp.asarray(whh_f_p),
                       'whh_b': jnp.asarray(whh_b_p),
                       'b': jnp.asarray(b_p)})
    out['lstm'] = layers

    wt = np_(params['hidden2tag_w_t'])          # (2*Hh, T)
    wt_f = np.zeros((Hh_p, Tp), np.float32)
    wt_b = np.zeros((Hh_p, Tp), np.float32)
    wt_f[:Hh, :target_size] = wt[:Hh]
    wt_b[:Hh, :target_size] = wt[Hh:]
    bt = np.zeros((1, Tp), np.float32)
    bt[0, :target_size] = np_(params['hidden2tag_b'])[0]

    start = np.full((1, Tp), NEG_INF, np.float32)
    start[0, :target_size] = np_(params['crf_start'])[0]
    end = np.full((1, Tp), NEG_INF, np.float32)
    end[0, :target_size] = np_(params['crf_end'])[0]
    trans = np.full((Tp, Tp), NEG_INF, np.float32)
    trans[:target_size, :target_size] = np_(params['crf_trans'])

    out['wt_f'] = jnp.asarray(wt_f)
    out['wt_b'] = jnp.asarray(wt_b)
    out['bt'] = jnp.asarray(bt)
    out['start'] = jnp.asarray(start)
    out['end'] = jnp.asarray(end)
    out['trans'] = jnp.asarray(trans)
    return out


# -----------------------------------------------------------------------------
# Pure-JAX reference (unpadded) for correctness check
# -----------------------------------------------------------------------------
def _ref_lstm_dir(x_smaj, w_ih_t, w_hh_t, b):
    Hh = w_hh_t.shape[0]
    B = x_smaj.shape[1]

    def step(carry, x_t):
        h, c = carry
        gates = x_t @ w_ih_t + h @ w_hh_t + b
        i_g = jax.nn.sigmoid(gates[:, :Hh])
        f_g = jax.nn.sigmoid(gates[:, Hh:2 * Hh])
        g_g = jnp.tanh(gates[:, 2 * Hh:3 * Hh])
        o_g = jax.nn.sigmoid(gates[:, 3 * Hh:])
        c = f_g * c + i_g * g_g
        h = o_g * jnp.tanh(c)
        return (h, c), h

    init = (jnp.zeros((B, Hh), jnp.float32), jnp.zeros((B, Hh), jnp.float32))
    _, hs = lax.scan(step, init, x_smaj)
    return hs


def _ref_forward(params, sentence, tags):
    emb = params['embedding'][sentence]
    h = jnp.transpose(emb, (1, 0, 2))
    for layer in params['lstm']:
        h_f = _ref_lstm_dir(h, layer['w_ih_t_f'], layer['w_hh_t_f'], layer['b_f'])
        h_b = _ref_lstm_dir(h[::-1], layer['w_ih_t_b'], layer['w_hh_t_b'],
                            layer['b_b'])[::-1]
        h = jnp.concatenate([h_f, h_b], axis=-1)
    em = h @ params['hidden2tag_w_t'] + params['hidden2tag_b']   # (S, B, T)
    start = params['crf_start'][0]
    end = params['crf_end'][0]
    trans = params['crf_trans']
    S, B, _ = em.shape
    tags_t = tags.T
    barange = jnp.arange(B)
    score = start[tags_t[0]] + em[0, barange, tags_t[0]]
    alpha = start[None, :] + em[0]
    for t in range(1, S):
        score = score + trans[tags_t[t - 1], tags_t[t]] + em[t, barange, tags_t[t]]
        alpha = jax.nn.logsumexp(
            alpha[:, :, None] + trans[None, :, :] + em[t][:, None, :], axis=1)
    score = score + end[tags_t[-1]]
    denom = jax.nn.logsumexp(alpha + end[None, :], axis=-1)
    return -jnp.mean(score - denom)


# -----------------------------------------------------------------------------
# Deterministic parameter init (shapes follow the PyTorch module __init__)
# -----------------------------------------------------------------------------
def init_params(key, vocab, hidden_dim, target_size, lstm_layers=2):
    Hh = hidden_dim // 2
    keys = iter(jax.random.split(key, 32))
    params = {
        'embedding': jax.random.normal(next(keys), (vocab, hidden_dim),
                                       jnp.float32) * 0.1,
    }
    layers = []
    in_size = hidden_dim
    for _ in range(lstm_layers):
        layer = {}
        for d in ('f', 'b'):
            w_ih = jax.random.normal(next(keys), (4 * Hh, in_size), jnp.float32) * 0.1
            w_hh = jax.random.normal(next(keys), (4 * Hh, Hh), jnp.float32) * 0.1
            b_ih = jax.random.normal(next(keys), (4 * Hh,), jnp.float32) * 0.1
            b_hh = jax.random.normal(next(keys), (4 * Hh,), jnp.float32) * 0.1
            layer[f'w_ih_t_{d}'] = w_ih.T                     # (in_size, 4*Hh)
            layer[f'w_hh_t_{d}'] = w_hh.T                     # (Hh, 4*Hh)
            layer[f'b_{d}'] = (b_ih + b_hh).reshape(1, -1)    # (1, 4*Hh)
        layers.append(layer)
        in_size = hidden_dim                                  # bidirectional output
    params['lstm'] = layers
    w_tag = jax.random.normal(next(keys), (target_size, hidden_dim), jnp.float32) * 0.1
    b_tag = jax.random.normal(next(keys), (target_size,), jnp.float32) * 0.1
    params['hidden2tag_w_t'] = w_tag.T                        # (H, T)
    params['hidden2tag_b'] = b_tag.reshape(1, -1)             # (1, T)
    params['crf_start'] = jax.random.normal(next(keys), (1, target_size),
                                            jnp.float32) * 0.1
    params['crf_end'] = jax.random.normal(next(keys), (1, target_size),
                                          jnp.float32) * 0.1
    params['crf_trans'] = jax.random.normal(next(keys), (target_size, target_size),
                                            jnp.float32) * 0.1
    return params


# -----------------------------------------------------------------------------
if __name__ == "__main__":
    B, S = 2, 8
    vocab = 50
    hidden_dim = 32
    target_size = 8

    key = jax.random.PRNGKey(0)
    k_par, k_tok, k_tag = jax.random.split(key, 3)

    params = init_params(k_par, vocab, hidden_dim, target_size)
    padded = pad_params(params, hidden_dim, target_size)

    sentence = jax.random.randint(k_tok, (B, S), 0, vocab, dtype=jnp.int32)
    attention_mask = jnp.ones((B, S), dtype=jnp.int32)
    tags = jax.random.randint(k_tag, (B, S), 0, target_size, dtype=jnp.int32)

    loss = bert_bilstm_crf_forward(padded, sentence, attention_mask, tags)
    loss = jax.block_until_ready(loss)

    loss_ref = jax.block_until_ready(_ref_forward(params, sentence, tags))
    assert jnp.isfinite(loss), "non-finite loss"
    assert jnp.allclose(loss, loss_ref, rtol=1e-3, atol=1e-3), (loss, loss_ref)

    print("KERNEL_OK")
</pallas_src>

<mosaic_0001>
module attributes {stable_mosaic.version = 11 : i64} {
  func.func @kernel(%arg0: memref<16x128xf32, #tpu.memory_space<vmem>>, %arg1: memref<128x1024xf32, #tpu.memory_space<vmem>>, %arg2: memref<1x1024xf32, #tpu.memory_space<vmem>>, %arg3: memref<16x512xf32, #tpu.memory_space<vmem>>, %arg4: memref<16x512xf32, #tpu.memory_space<vmem>>) attributes {dimension_semantics = [], scalar_prefetch = 0 : i64, scratch_operands = 0 : i64, tpu.core_type = #tpu.core_type<tc>} {
    %c0 = arith.constant 0 : index
    %c0_0 = arith.constant 0 : index
    %0 = vector.load %arg0[%c0, %c0_0] : memref<16x128xf32, #tpu.memory_space<vmem>>, vector<16x128xf32>
    %c0_1 = arith.constant 0 : index
    %c0_2 = arith.constant 0 : index
    %1 = vector.load %arg1[%c0_1, %c0_2] : memref<128x1024xf32, #tpu.memory_space<vmem>>, vector<128x1024xf32>
    %cst = arith.constant dense<0.000000e+00> : vector<16x1024xf32>
    %2 = tpu.matmul %0, %1, %cst {dimension_numbers = #tpu.dot_dimension_numbers<[1], [0], [0], [1], [0, 0, 1, 1], [], []>} : vector<16x128xf32>, vector<128x1024xf32>, vector<16x1024xf32> -> vector<16x1024xf32>
    %c0_3 = arith.constant 0 : index
    %c0_4 = arith.constant 0 : index
    %3 = vector.load %arg2[%c0_3, %c0_4] : memref<1x1024xf32, #tpu.memory_space<vmem>>, vector<1x1024xf32>
    %4 = vector.broadcast %3 : vector<1x1024xf32> to vector<16x1024xf32>
    %5 = arith.addf %2, %4 : vector<16x1024xf32>
    %6 = vector.extract_strided_slice %5 {offsets = [0, 0], sizes = [16, 512], strides = [1, 1]} : vector<16x1024xf32> to vector<16x512xf32>
    %c0_5 = arith.constant 0 : index
    %c0_6 = arith.constant 0 : index
    %7 = vector.load %arg3[%c0_5, %c0_6] : memref<16x512xf32, #tpu.memory_space<vmem>>, vector<16x512xf32>
    tpu.vector_store %arg3[%c0_5, %c0_6], %6 {strides = array<i32>} : memref<16x512xf32, #tpu.memory_space<vmem>>, vector<16x512xf32>,
    %8 = vector.extract_strided_slice %5 {offsets = [0, 512], sizes = [16, 512], strides = [1, 1]} : vector<16x1024xf32> to vector<16x512xf32>
    %c0_7 = arith.constant 0 : index
    %c0_8 = arith.constant 0 : index
    %9 = vector.load %arg4[%c0_7, %c0_8] : memref<16x512xf32, #tpu.memory_space<vmem>>, vector<16x512xf32>
    tpu.vector_store %arg4[%c0_7, %c0_8], %8 {strides = array<i32>} : memref<16x512xf32, #tpu.memory_space<vmem>>, vector<16x512xf32>,
    return
  }
}

</mosaic_0001>

<bundles_post_ra>
// kernel: tpu_custom_call.1
= control target key start
LH: loop header
LB: loop body
LE: loop exit
PB: predicated region body
PF: predicated region fallthrough
CT: control target
= control target key end

     0   :  { %10 = vsyncpa [#allocation3], 0  ;;  %s968_s0 = inlined_call_operand.hbm [shape: f32[16,128], index: 0, kind: input, shape index: {}]   ;;  %s969_s1 = inlined_call_operand.hbm [shape: f32[128,1024], index: 1, kind: input, shape index: {}]   ;;  %s970_s2 = inlined_call_operand.hbm [shape: f32[1,1024], index: 2, kind: input, shape index: {}]   ;;  %s971_s3 = inlined_call_operand.hbm [shape: f32[16,512], index: 3, kind: output, shape index: {0}]   ;;  %s972_s4 = inlined_call_operand.hbm [shape: f32[16,512], index: 4, kind: output, shape index: {1}]  }
   0x1   :  { %11 = vsyncpa [#allocation6], 0 }
   0x2   :  { %12 = vsyncpa [#allocation4], 0 }
   0x3   :  { %13 = vsyncpa [#allocation10], 0  ;;  %s845_s15 = smov [#allocation5]   ;;  %s727_s19 = scalar_lea.hbm %s969_s1, 16384 }
   0x4   :  { %s31_s16 = sshll.u32 %s845_s15, 4  ;;  %p728_p0 = scmp.ne.s32.totalorder %s969_s1, %s727_s19  ;;  %s32_s16 = int_to_ptr.vmem [resolvable:$true] %s31_s16 }
   0x5   :  { %p731_p1 = scmp.lt.u32.totalorder %s727_s19, %s969_s1 }
   0x7   :  { %p733_p2 = pnand %p731_p1, %p728_p0 }
   0x9   :  { %736 = shalt.err (!%p733_p2)
}
   0xa   :  { %s737_s24 = scalar_lea.vmem %s32_s16, 16384  ;;  %p742_p4 = scmp.lt.s32.totalorder %s32_s16, %s32_s16 }
   0xb   :  { %p738_p3 = scmp.ne.s32.totalorder %s32_s16, %s737_s24  ;;  %p743_p5 = scmp.lt.s32.totalorder %s737_s24, %s737_s24 }
   0xd   :  { %p744_p6 = por %p743_p5, %p742_p4 }
   0xf   :  { %p745_p7 = pnand %p744_p6, %p738_p3 }
  0x11   :  { %748 = shalt.err (!%p745_p7)
}
  0x12   :  { %s846_s25 = smov 1024   ;;  %s847_s26 = smov 64  }
  0x13   :  { %37 = dma.hbm_to_vmem [thread:$0]  %s969_s1, 16384, %s32_s16, [#allocation6], %s846_s25, %s846_s25, %s847_s26  }
  0x14   :  { %s848_s29 = smov [#allocation2]   ;;  %s749_s7 = scalar_lea.hbm %s968_s0, 256 }
  0x15   :  { %s19_s30 = sshll.u32 %s848_s29, 4  ;;  %p750_p8 = scmp.ne.s32.totalorder %s968_s0, %s749_s7  ;;  %s20_s30 = int_to_ptr.vmem [resolvable:$true] %s19_s30 }
  0x16   :  { %p753_p9 = scmp.lt.u32.totalorder %s749_s7, %s968_s0 }
  0x18   :  { %p755_p10 = pnand %p753_p9, %p750_p8 }
  0x1a   :  { %758 = shalt.err (!%p755_p10)
}
  0x1b   :  { %s759_s12 = scalar_lea.vmem %s20_s30, 256  ;;  %p764_p12 = scmp.lt.s32.totalorder %s20_s30, %s20_s30 }
  0x1c   :  { %p760_p11 = scmp.ne.s32.totalorder %s20_s30, %s759_s12  ;;  %p765_p13 = scmp.lt.s32.totalorder %s759_s12, %s759_s12 }
  0x1e   :  { %p766_p0 = por %p765_p13, %p764_p12 }
  0x20   :  { %p767_p1 = pnand %p766_p0, %p760_p11 }
  0x22   :  { %770 = shalt.err (!%p767_p1)
}
  0x23   :  { %s849_s1 = smov 128   ;;  %s850_s13 = smov 8  }
  0x24   :  { %25 = dma.hbm_to_vmem [thread:$0]  %s968_s0, 256, %s20_s30, [#allocation3], %s849_s1, %s849_s1, %s850_s13  }
  0x25   :  { %s851_s16 = smov [#allocation7]   ;;  %s771_s20 = scalar_lea.hbm %s970_s2, 128 }
  0x26   :  { %s44_s17 = sshll.u32 %s851_s16, 4  ;;  %p772_p2 = scmp.ne.s32.totalorder %s970_s2, %s771_s20  ;;  %s45_s17 = int_to_ptr.vmem [resolvable:$true] %s44_s17 }
  0x27   :  { %p775_p3 = scmp.lt.u32.totalorder %s771_s20, %s970_s2 }
  0x29   :  { %p777_p4 = pnand %p775_p3, %p772_p2 }
  0x2b   :  { %780 = shalt.err (!%p777_p4)
}
  0x2c   :  { %s781_s25 = scalar_lea.vmem %s45_s17, 128  ;;  %p786_p6 = scmp.lt.s32.totalorder %s45_s17, %s45_s17 }
  0x2d   :  { %p782_p5 = scmp.ne.s32.totalorder %s45_s17, %s781_s25  ;;  %p787_p7 = scmp.lt.s32.totalorder %s781_s25, %s781_s25 }
  0x2f   :  { %p788_p8 = por %p787_p7, %p786_p6 }
  0x31   :  { %p789_p9 = pnand %p788_p8, %p782_p5 }
  0x33   :  { %792 = shalt.err (!%p789_p9)
}
  0x34   :  { %47 = dma.hbm_to_vmem [thread:$0]  %s970_s2, 128, %s45_s17, [#allocation6]  }
  0x35   :  { %837 = dma.done.wait [#allocation3], 256  }
  0x36   :  { %838 = vsyncadd [#allocation3], 4294967040 }
  0x37   :  { %839 = dma.done.wait [#allocation6], 16512  }
  0x38   :  { %840 = vsyncadd [#allocation6], 4294950784  ;;  %v852_v0 = vmov 0.0   ;;  %v60_v1 = vld [vmem:[#allocation5 + $0x8] sm:$0xff]  ;;  %v62_v3 = vld [vmem:[#allocation5 + $0x18] sm:$0xff]  ;;  %s853_s2 = smov [#allocation8]  }
  0x39   :  { %293 = vmatprep.mubr.f32.mxu0 %v852_v0  ;;  %370 = vmatprep.mubr.f32.mxu1 %v852_v0  ;;  %v68_v2 = vld [vmem:[#allocation5 + $0x48] sm:$0xff]  ;;  %v70_v5 = vld [vmem:[#allocation5 + $0x58] sm:$0xff]  ;;  %v59_v6 = vld [vmem:[#allocation5] sm:$0xff]  ;;  %s558_s27 = sshll.u32 %s853_s2, 4  ;;  %s559_s27 = int_to_ptr.vmem [resolvable:$true] %s558_s27 }
  0x3a   :  { %v587_v4 = vpack.c.bf16 %v68_v2, %v60_v1  ;;  %v67_v7 = vld [vmem:[#allocation5 + $0x40] sm:$0xff]  ;;  %v619_v8 = vpack.c.bf16 %v70_v5, %v62_v3  ;;  %v61_v10 = vld [vmem:[#allocation5 + $0x10] sm:$0xff]  ;;  %v76_v12 = vld [vmem:[#allocation5 + $0x88] sm:$0xff]  ;;  %s793_s28 = scalar_lea.vmem %s559_s27, 1024  ;;  %p798_p11 = scmp.lt.s32.totalorder %s559_s27, %s559_s27 }
  0x3b   :  { %v589_v9 = vpack.c.bf16 %v67_v7, %v59_v6  ;;  %v69_v11 = vld [vmem:[#allocation5 + $0x50] sm:$0xff]  ;;  %v84_v14 = vld [vmem:[#allocation5 + $0xc8] sm:$0xff]  ;;  %v78_v15 = vld [vmem:[#allocation5 + $0x98] sm:$0xff]  ;;  %p794_p10 = scmp.ne.s32.totalorder %s559_s27, %s793_s28  ;;  %p799_p12 = scmp.lt.s32.totalorder %s793_s28, %s793_s28 }
  0x3c   :  { %588 = vmatprep.subr.bf16.mxu0 %v587_v4  ;;  %v621_v13 = vpack.c.bf16 %v69_v11, %v61_v10  ;;  %v86_v16 = vld [vmem:[#allocation5 + $0xd8] sm:$0xff]  ;;  %620 = vmatprep.subr.bf16.mxu1 %v619_v8  ;;  %v591_v17 = vpack.c.bf16 %v84_v14, %v76_v12  ;;  %v75_v19 = vld [vmem:[#allocation5 + $0x80] sm:$0xff]  ;;  %v77_v21 = vld [vmem:[#allocation5 + $0x90] sm:$0xff] }
  0x3d   :  { %590 = vmatpush1.bf16.msra.mxu0 %v589_v9  ;;  %v623_v18 = vpack.c.bf16 %v86_v16, %v78_v15  ;;  %v83_v20 = vld [vmem:[#allocation5 + $0xc0] sm:$0xff]  ;;  %v85_v23 = vld [vmem:[#allocation5 + $0xd0] sm:$0xff]  ;;  %v92_v24 = vld [vmem:[#allocation5 + $0x108] sm:$0xff]  ;;  %p800_p13 = por %p799_p12, %p798_p11 }
  0x3e   :  { %622 = vmatpush1.bf16.msra.mxu1 %v621_v13  ;;  %v593_v22 = vpack.c.bf16 %v83_v20, %v75_v19  ;;  %v100_v25 = vld [vmem:[#allocation5 + $0x148] sm:$0xff]  ;;  %592 = vmatprep.subr.bf16.mxu0 %v591_v17  ;;  %v625_v26 = vpack.c.bf16 %v85_v23, %v77_v21  ;;  %v94_v28 = vld [vmem:[#allocation5 + $0x118] sm:$0xff]  ;;  %v91_v30 = vld [vmem:[#allocation5 + $0x100] sm:$0xff] }
  0x3f   :  { %624 = vmatprep.subr.bf16.mxu1 %v623_v18  ;;  %v595_v27 = vpack.c.bf16 %v100_v25, %v92_v24  ;;  %v102_v29 = vld [vmem:[#allocation5 + $0x158] sm:$0xff]  ;;  %v99_v32 = vld [vmem:[#allocation5 + $0x140] sm:$0xff]  ;;  %v93_v33 = vld [vmem:[#allocation5 + $0x110] sm:$0xff]  ;;  %p801_p0 = pnand %p800_p13, %p794_p10 }
  0x40   :  { %v627_v31 = vpack.c.bf16 %v102_v29, %v94_v28  ;;  %v101_v34 = vld [vmem:[#allocation5 + $0x150] sm:$0xff]  ;;  %v597_v35 = vpack.c.bf16 %v99_v32, %v91_v30  ;;  %v108_v36 = vld [vmem:[#allocation5 + $0x188] sm:$0xff]  ;;  %v110_v38 = vld [vmem:[#allocation5 + $0x198] sm:$0xff] }
  0x41   :  { %594 = vmatpush1.bf16.msra.mxu0 %v593_v22  ;;  %v116_v37 = vld [vmem:[#allocation5 + $0x1c8] sm:$0xff]  ;;  %v629_v39 = vpack.c.bf16 %v101_v34, %v93_v33  ;;  %v118_v41 = vld [vmem:[#allocation5 + $0x1d8] sm:$0xff]  ;;  %v107_v42 = vld [vmem:[#allocation5 + $0x180] sm:$0xff] }
  0x42   :  { %626 = vmatpush1.bf16.msra.mxu1 %v625_v26  ;;  %596 = vmatprep.subr.bf16.mxu0 %v595_v27  ;;  %v599_v40 = vpack.c.bf16 %v116_v37, %v108_v36  ;;  %v115_v43 = vld [vmem:[#allocation5 + $0x1c0] sm:$0xff]  ;;  %v631_v44 = vpack.c.bf16 %v118_v41, %v110_v38  ;;  %v109_v45 = vld [vmem:[#allocation5 + $0x190] sm:$0xff]  ;;  %v124_v47 = vld [vmem:[#allocation5 + $0x208] sm:$0xff] }
  0x43   :  { %628 = vmatprep.subr.bf16.mxu1 %v627_v31  ;;  %v117_v46 = vld [vmem:[#allocation5 + $0x1d0] sm:$0xff]  ;;  %v132_v48 = vld [vmem:[#allocation5 + $0x248] sm:$0xff]  ;;  %v126_v49 = vld [vmem:[#allocation5 + $0x218] sm:$0xff]  ;;  %v601_v51 = vpack.c.bf16 %v115_v43, %v107_v42 }
  0x44   :  { %v134_v50 = vld [vmem:[#allocation5 + $0x258] sm:$0xff]  ;;  %v633_v52 = vpack.c.bf16 %v117_v46, %v109_v45  ;;  %v603_v53 = vpack.c.bf16 %v132_v48, %v124_v47  ;;  %v123_v54 = vld [vmem:[#allocation5 + $0x200] sm:$0xff]  ;;  %v125_v56 = vld [vmem:[#allocation5 + $0x210] sm:$0xff] }
  0x45   :  { %598 = vmatpush1.bf16.msra.mxu0 %v597_v35  ;;  %v131_v55 = vld [vmem:[#allocation5 + $0x240] sm:$0xff]  ;;  %v635_v57 = vpack.c.bf16 %v134_v50, %v126_v49  ;;  %v133_v58 = vld [vmem:[#allocation5 + $0x250] sm:$0xff]  ;;  %v140_v59 = vld [vmem:[#allocation5 + $0x288] sm:$0xff] }
  0x46   :  { %630 = vmatpush1.bf16.msra.mxu1 %v629_v39  ;;  %600 = vmatprep.subr.bf16.mxu0 %v599_v40  ;;  %v148_v60 = vld [vmem:[#allocation5 + $0x2c8] sm:$0xff]  ;;  %v142_v61 = vld [vmem:[#allocation5 + $0x298] sm:$0xff]  ;;  %v605_v63 = vpack.c.bf16 %v131_v55, %v123_v54  ;;  %v637_v1 = vpack.c.bf16 %v133_v58, %v125_v56  ;;  %v139_v3 = vld [vmem:[#allocation5 + $0x280] sm:$0xff] }
  0x47   :  { %632 = vmatprep.subr.bf16.mxu1 %v631_v44  ;;  %v150_v62 = vld [vmem:[#allocation5 + $0x2d8] sm:$0xff]  ;;  %v607_v2 = vpack.c.bf16 %v148_v60, %v140_v59  ;;  %v147_v4 = vld [vmem:[#allocation5 + $0x2c0] sm:$0xff]  ;;  %v141_v5 = vld [vmem:[#allocation5 + $0x290] sm:$0xff] }
  0x48   :  { %v639_v6 = vpack.c.bf16 %v150_v62, %v142_v61  ;;  %v149_v7 = vld [vmem:[#allocation5 + $0x2d0] sm:$0xff]  ;;  %v156_v8 = vld [vmem:[#allocation5 + $0x308] sm:$0xff]  ;;  %v158_v10 = vld [vmem:[#allocation5 + $0x318] sm:$0xff]  ;;  %v609_v12 = vpack.c.bf16 %v147_v4, %v139_v3 }
  0x49   :  { %602 = vmatpush1.bf16.msra.mxu0 %v601_v51  ;;  %v164_v9 = vld [vmem:[#allocation5 + $0x348] sm:$0xff]  ;;  %v166_v11 = vld [vmem:[#allocation5 + $0x358] sm:$0xff]  ;;  %v641_v13 = vpack.c.bf16 %v149_v7, %v141_v5  ;;  %v155_v15 = vld [vmem:[#allocation5 + $0x300] sm:$0xff] }
  0x4a   :  { %634 = vmatpush1.bf16.msra.mxu1 %v633_v52  ;;  %604 = vmatprep.subr.bf16.mxu0 %v603_v53  ;;  %v611_v14 = vpack.c.bf16 %v164_v9, %v156_v8  ;;  %v163_v16 = vld [vmem:[#allocation5 + $0x340] sm:$0xff]  ;;  %v157_v17 = vld [vmem:[#allocation5 + $0x310] sm:$0xff]  ;;  %v643_v18 = vpack.c.bf16 %v166_v11, %v158_v10  ;;  %v172_v20 = vld [vmem:[#allocation5 + $0x388] sm:$0xff] }
  0x4b   :  { %636 = vmatprep.subr.bf16.mxu1 %v635_v57  ;;  %v165_v19 = vld [vmem:[#allocation5 + $0x350] sm:$0xff]  ;;  %v180_v21 = vld [vmem:[#allocation5 + $0x3c8] sm:$0xff]  ;;  %v174_v22 = vld [vmem:[#allocation5 + $0x398] sm:$0xff]  ;;  %v613_v24 = vpack.c.bf16 %v163_v16, %v155_v15 }
  0x4c   :  { %v182_v23 = vld [vmem:[#allocation5 + $0x3d8] sm:$0xff]  ;;  %v645_v25 = vpack.c.bf16 %v165_v19, %v157_v17  ;;  %v615_v26 = vpack.c.bf16 %v180_v21, %v172_v20  ;;  %v171_v27 = vld [vmem:[#allocation5 + $0x380] sm:$0xff]  ;;  %v173_v29 = vld [vmem:[#allocation5 + $0x390] sm:$0xff] }
  0x4d   :  { %606 = vmatpush1.bf16.msra.mxu0 %v605_v63  ;;  %v179_v28 = vld [vmem:[#allocation5 + $0x3c0] sm:$0xff]  ;;  %v647_v30 = vpack.c.bf16 %v182_v23, %v174_v22  ;;  %v181_v31 = vld [vmem:[#allocation5 + $0x3d0] sm:$0xff]  ;;  %v64_v32 = vld [vmem:[#allocation5 + $0x28] sm:$0xff] }
  0x4e   :  { %638 = vmatpush1.bf16.msra.mxu1 %v637_v1  ;;  %608 = vmatprep.subr.bf16.mxu0 %v607_v2  ;;  %v72_v33 = vld [vmem:[#allocation5 + $0x68] sm:$0xff]  ;;  %v66_v34 = vld [vmem:[#allocation5 + $0x38] sm:$0xff]  ;;  %v617_v36 = vpack.c.bf16 %v179_v28, %v171_v27  ;;  %v649_v37 = vpack.c.bf16 %v181_v31, %v173_v29  ;;  %v63_v39 = vld [vmem:[#allocation5 + $0x20] sm:$0xff] }
  0x4f   :  { %640 = vmatprep.subr.bf16.mxu1 %v639_v6  ;;  %v74_v35 = vld [vmem:[#allocation5 + $0x78] sm:$0xff]  ;;  %v651_v38 = vpack.c.bf16 %v72_v33, %v64_v32  ;;  %v71_v40 = vld [vmem:[#allocation5 + $0x60] sm:$0xff]  ;;  %v65_v41 = vld [vmem:[#allocation5 + $0x30] sm:$0xff] }
  0x50   :  { %v683_v42 = vpack.c.bf16 %v74_v35, %v66_v34  ;;  %v73_v43 = vld [vmem:[#allocation5 + $0x70] sm:$0xff]  ;;  %v80_v44 = vld [vmem:[#allocation5 + $0xa8] sm:$0xff]  ;;  %v82_v46 = vld [vmem:[#allocation5 + $0xb8] sm:$0xff]  ;;  %v653_v49 = vpack.c.bf16 %v71_v40, %v63_v39 }
  0x51   :  { %610 = vmatpush1.bf16.msra.mxu0 %v609_v12  ;;  %v88_v45 = vld [vmem:[#allocation5 + $0xe8] sm:$0xff]  ;;  %v90_v47 = vld [vmem:[#allocation5 + $0xf8] sm:$0xff]  ;;  %v920_v48 = vld [vmem:[#allocation2] sm:$0xff]  ;;  %v685_v50 = vpack.c.bf16 %v73_v43, %v65_v41 }
  0x52   :  { %642 = vmatpush1.bf16.msra.mxu1 %v641_v13  ;;  %612 = vmatprep.subr.bf16.mxu0 %v611_v14  ;;  %v655_v51 = vpack.c.bf16 %v88_v45, %v80_v44  ;;  %v79_v52 = vld [vmem:[#allocation5 + $0xa0] sm:$0xff]  ;;  %v81_v54 = vld [vmem:[#allocation5 + $0xb0] sm:$0xff]  ;;  %v687_v55 = vpack.c.bf16 %v90_v47, %v82_v46  ;;  %v96_v57 = vld [vmem:[#allocation5 + $0x128] sm:$0xff] }
  0x53   :  { %644 = vmatprep.subr.bf16.mxu1 %v643_v18  ;;  %v87_v53 = vld [vmem:[#allocation5 + $0xe0] sm:$0xff]  ;;  %v89_v56 = vld [vmem:[#allocation5 + $0xf0] sm:$0xff]  ;;  %v104_v58 = vld [vmem:[#allocation5 + $0x168] sm:$0xff] }
  0x54   :  { %v98_v59 = vld [vmem:[#allocation5 + $0x138] sm:$0xff]  ;;  %v657_v61 = vpack.c.bf16 %v87_v53, %v79_v52  ;;  %v689_v62 = vpack.c.bf16 %v89_v56, %v81_v54  ;;  %v659_v63 = vpack.c.bf16 %v104_v58, %v96_v57  ;;  %v95_v1 = vld [vmem:[#allocation5 + $0x120] sm:$0xff]  ;;  %v97_v3 = vld [vmem:[#allocation5 + $0x130] sm:$0xff] }
  0x55   :  { %614 = vmatpush1.bf16.msra.mxu0 %v613_v24  ;;  %v106_v60 = vld [vmem:[#allocation5 + $0x178] sm:$0xff]  ;;  %v103_v2 = vld [vmem:[#allocation5 + $0x160] sm:$0xff]  ;;  %v105_v5 = vld [vmem:[#allocation5 + $0x170] sm:$0xff] }
  0x56   :  { %646 = vmatpush1.bf16.msra.mxu1 %v645_v25  ;;  %616 = vmatprep.subr.bf16.mxu0 %v615_v26  ;;  %v691_v4 = vpack.c.bf16 %v106_v60, %v98_v59  ;;  %v112_v6 = vld [vmem:[#allocation5 + $0x1a8] sm:$0xff]  ;;  %v114_v8 = vld [vmem:[#allocation5 + $0x1b8] sm:$0xff]  ;;  %v661_v10 = vpack.c.bf16 %v103_v2, %v95_v1  ;;  %v693_v12 = vpack.c.bf16 %v105_v5, %v97_v3  ;;  %v111_v14 = vld [vmem:[#allocation5 + $0x1a0] sm:$0xff] }
  0x57   :  { %648 = vmatprep.subr.bf16.mxu1 %v647_v30  ;;  %v120_v7 = vld [vmem:[#allocation5 + $0x1e8] sm:$0xff]  ;;  %v122_v9 = vld [vmem:[#allocation5 + $0x1f8] sm:$0xff]  ;;  %v119_v15 = vld [vmem:[#allocation5 + $0x1e0] sm:$0xff] }
  0x58   :  { %v926_v11 = vld [vmem:[#allocation2 + $0x8] sm:$0xff]  ;;  %v663_v13 = vpack.c.bf16 %v120_v7, %v112_v6  ;;  %v113_v16 = vld [vmem:[#allocation5 + $0x1b0] sm:$0xff]  ;;  %v695_v17 = vpack.c.bf16 %v122_v9, %v114_v8  ;;  %v128_v19 = vld [vmem:[#allocation5 + $0x228] sm:$0xff]  ;;  %v665_v23 = vpack.c.bf16 %v119_v15, %v111_v14  ;;  %v189_v7 = vlaneseq }
  0x59   :  { %618 = vmatpush1.bf16.msra.mxu0 %v617_v36  ;;  %v121_v18 = vld [vmem:[#allocation5 + $0x1f0] sm:$0xff]  ;;  %v136_v20 = vld [vmem:[#allocation5 + $0x268] sm:$0xff]  ;;  %v130_v21 = vld [vmem:[#allocation5 + $0x238] sm:$0xff] }
  0x5a   :  { %650 = vmatpush1.bf16.msra.mxu1 %v649_v37  ;;  %652 = vmatprep.subr.bf16.mxu0 %v651_v38  ;;  %v138_v22 = vld [vmem:[#allocation5 + $0x278] sm:$0xff]  ;;  %v697_v24 = vpack.c.bf16 %v121_v18, %v113_v16  ;;  %v667_v25 = vpack.c.bf16 %v136_v20, %v128_v19  ;;  %v127_v26 = vld [vmem:[#allocation5 + $0x220] sm:$0xff]  ;;  %v129_v28 = vld [vmem:[#allocation5 + $0x230] sm:$0xff]  ;;  %v190_v8 = vshrl.u32 %v189_v7, 7 }
  0x5b   :  { %684 = vmatprep.subr.bf16.mxu1 %v683_v42  ;;  %v135_v27 = vld [vmem:[#allocation5 + $0x260] sm:$0xff]  ;;  %v699_v29 = vpack.c.bf16 %v138_v22, %v130_v21  ;;  %v137_v30 = vld [vmem:[#allocation5 + $0x270] sm:$0xff]  ;;  %v144_v31 = vld [vmem:[#allocation5 + $0x2a8] sm:$0xff] }
  0x5c   :  { %294 = vmatmul.mubr.f32.vlgmr.msra.gmra.mrb[0].mxu0 %v920_v48  ;;  %v152_v32 = vld [vmem:[#allocation5 + $0x2e8] sm:$0xff]  ;;  %v146_v33 = vld [vmem:[#allocation5 + $0x2b8] sm:$0xff]  ;;  %v669_v35 = vpack.c.bf16 %v135_v27, %v127_v26  ;;  %v701_v36 = vpack.c.bf16 %v137_v30, %v129_v28  ;;  %v143_v38 = vld [vmem:[#allocation5 + $0x2a0] sm:$0xff]  ;;  %v191_v9 = vsub.s32 0, %v190_v8  ;;  %v203_v14 = vsub.s32 3, %v190_v8 }
  0x5d   :  { %371 = vmatmul.mubr.f32.vlgmr.msra.gmra.mrb[0].mxu1 %v920_v48  ;;  %654 = vmatpush1.bf16.msra.mxu0 %v653_v49  ;;  %v154_v34 = vld [vmem:[#allocation5 + $0x2f8] sm:$0xff]  ;;  %v671_v37 = vpack.c.bf16 %v152_v32, %v144_v31  ;;  %v151_v39 = vld [vmem:[#allocation5 + $0x2e0] sm:$0xff]  ;;  %v145_v40 = vld [vmem:[#allocation5 + $0x2b0] sm:$0xff] }
  0x5e   :  { %686 = vmatpush1.bf16.msra.mxu1 %v685_v50  ;;  %656 = vmatprep.subr.bf16.mxu0 %v655_v51  ;;  %v703_v41 = vpack.c.bf16 %v154_v34, %v146_v33  ;;  %v153_v42 = vld [vmem:[#allocation5 + $0x2f0] sm:$0xff]  ;;  %v160_v43 = vld [vmem:[#allocation5 + $0x328] sm:$0xff]  ;;  %v162_v45 = vld [vmem:[#allocation5 + $0x338] sm:$0xff]  ;;  %v673_v47 = vpack.c.bf16 %v151_v39, %v143_v38 }
  0x5f   :  { %688 = vmatprep.subr.bf16.mxu1 %v687_v55  ;;  %299 = vmatprep.mubr.f32.mxu0 %v852_v0  ;;  %v168_v44 = vld [vmem:[#allocation5 + $0x368] sm:$0xff]  ;;  %v170_v46 = vld [vmem:[#allocation5 + $0x378] sm:$0xff]  ;;  %v705_v49 = vpack.c.bf16 %v153_v42, %v145_v40  ;;  %v159_v51 = vld [vmem:[#allocation5 + $0x320] sm:$0xff] }
  0x60   :  { %376 = vmatprep.mubr.f32.mxu1 %v852_v0  ;;  %300 = vmatmul.mubr.f32.gmra.mrb[2].mxu0 %v926_v11  ;;  %v675_v50 = vpack.c.bf16 %v168_v44, %v160_v43  ;;  %v167_v52 = vld [vmem:[#allocation5 + $0x360] sm:$0xff]  ;;  %v161_v53 = vld [vmem:[#allocation5 + $0x330] sm:$0xff]  ;;  %v707_v54 = vpack.c.bf16 %v170_v46, %v162_v45  ;;  %v176_v56 = vld [vmem:[#allocation5 + $0x3a8] sm:$0xff] }
  0x61   :  { %658 = vmatpush1.bf16.msra.mxu0 %v657_v61  ;;  %377 = vmatmul.mubr.f32.gmra.mrb[2].mxu1 %v926_v11  ;;  %v169_v55 = vld [vmem:[#allocation5 + $0x370] sm:$0xff]  ;;  %v184_v57 = vld [vmem:[#allocation5 + $0x3e8] sm:$0xff]  ;;  %v178_v58 = vld [vmem:[#allocation5 + $0x3b8] sm:$0xff]  ;;  %v677_v60 = vpack.c.bf16 %v167_v52, %v159_v51 }
  0x62   :  { %690 = vmatpush1.bf16.msra.mxu1 %v689_v62  ;;  %660 = vmatprep.subr.bf16.mxu0 %v659_v63  ;;  %v186_v59 = vld [vmem:[#allocation5 + $0x3f8] sm:$0xff]  ;;  %v709_v61 = vpack.c.bf16 %v169_v55, %v161_v53  ;;  %v679_v62 = vpack.c.bf16 %v184_v57, %v176_v56  ;;  %v175_v63 = vld [vmem:[#allocation5 + $0x3a0] sm:$0xff]  ;;  %v177_v3 = vld [vmem:[#allocation5 + $0x3b0] sm:$0xff] }
  0x63   :  { %692 = vmatprep.subr.bf16.mxu1 %v691_v4  ;;  %447 = vmatprep.mubr.f32.mxu0 %v852_v0  ;;  %v183_v1 = vld [vmem:[#allocation5 + $0x3e0] sm:$0xff]  ;;  %v711_v2 = vpack.c.bf16 %v186_v59, %v178_v58  ;;  %v185_v4 = vld [vmem:[#allocation5 + $0x3f0] sm:$0xff] }
  0x64   :  { %524 = vmatprep.mubr.f32.mxu1 %v852_v0  ;;  %v681_v5 = vpack.c.bf16 %v183_v1, %v175_v63  ;;  %v713_v6 = vpack.c.bf16 %v185_v4, %v177_v3 }
  0x65   :  { %662 = vmatpush1.bf16.msra.mxu0 %v661_v10  ;;  %v187_v10 = vld [vmem:[#allocation7] sm:$0xff] }
  0x66   :  { %694 = vmatpush1.bf16.msra.mxu1 %v693_v12  ;;  %664 = vmatprep.subr.bf16.mxu0 %v663_v13  ;;  %v199_v12 = vsub.s32 2, %v190_v8  ;;  %v195_v13 = vsub.s32 1, %v190_v8  ;;  %v192_v15 = vrot.slane %v187_v10, %v191_v9  ;;  %v204_v18 = vrot.slane %v187_v10, %v203_v14 }
  0x67   :  { %696 = vmatprep.subr.bf16.mxu1 %v695_v17 }
  0x68   :  { %v200_v16 = vrot.slane %v187_v10, %v199_v12  ;;  %v196_v17 = vrot.slane %v187_v10, %v195_v13 }
  0x69   :  { %666 = vmatpush1.bf16.msra.mxu0 %v665_v23 }
  0x6a   :  { %698 = vmatpush1.bf16.msra.mxu1 %v697_v24  ;;  %668 = vmatprep.subr.bf16.mxu0 %v667_v25 }
  0x6b   :  { %700 = vmatprep.subr.bf16.mxu1 %v699_v29 }
  0x6d   :  { %670 = vmatpush1.bf16.msra.mxu0 %v669_v35 }
  0x6e   :  { %702 = vmatpush1.bf16.msra.mxu1 %v701_v36  ;;  %672 = vmatprep.subr.bf16.mxu0 %v671_v37 }
  0x6f   :  { %704 = vmatprep.subr.bf16.mxu1 %v703_v41 }
  0x71   :  { %674 = vmatpush1.bf16.msra.mxu0 %v673_v47 }
  0x72   :  { %706 = vmatpush1.bf16.msra.mxu1 %v705_v49  ;;  %676 = vmatprep.subr.bf16.mxu0 %v675_v50 }
  0x73   :  { %708 = vmatprep.subr.bf16.mxu1 %v707_v54 }
  0x75   :  { %678 = vmatpush1.bf16.msra.mxu0 %v677_v60 }
  0x76   :  { %710 = vmatpush1.bf16.msra.mxu1 %v709_v61  ;;  %680 = vmatprep.subr.bf16.mxu0 %v679_v62 }
  0x77   :  { %712 = vmatprep.subr.bf16.mxu1 %v711_v2 }
  0x79   :  { %682 = vmatpush1.bf16.msra.mxu0 %v681_v5 }
  0x7a   :  { %714 = vmatpush1.bf16.msra.mxu1 %v713_v6 }
  0x7c   :  { %448 = vmatmul.mubr.f32.vlgmr.msra.gmra.mrb[4].mxu0 %v920_v48 }
  0x7d   :  { %525 = vmatmul.mubr.f32.vlgmr.msra.gmra.mrb[4].mxu1 %v920_v48  ;;  %453 = vmatprep.mubr.f32.mxu0 %v852_v0 }
  0x7e   :  { %530 = vmatprep.mubr.f32.mxu1 %v852_v0 }
  0x80   :  { %454 = vmatmul.mubr.f32.gmra.mrb[6].mxu0 %v926_v11 }
  0x81   :  { %531 = vmatmul.mubr.f32.gmra.mrb[6].mxu1 %v926_v11 }
 0x12f   :  { %v295_v48 = vpop.f32.mrb[0].mxu0 }
 0x130   :  { %v296_v19 = vadd.f32 %v295_v48, %v192_v15  ;;  %v372_v20 = vpop.f32.mrb[0].mxu1  ;;  %v297_v21 = vpop.f32.mrb[1].mxu0 }
 0x131   :  { %v373_v0 = vadd.f32 %v372_v20, %v200_v16  ;;  %v298_v22 = vadd.f32 %v297_v21, %v196_v17  ;;  %v374_v23 = vpop.f32.mrb[1].mxu1 }
 0x132   :  { %537 = vst [vmem:[#allocation8] sm:$0xff] %v296_v19  ;;  %v375_v11 = vadd.f32 %v374_v23, %v204_v18 }
 0x133   :  { %539 = vst [vmem:[#allocation8 + $0x10] sm:$0xff] %v373_v0  ;;  %538 = vst [vmem:[#allocation8 + $0x8] sm:$0xff] %v298_v22  ;;  %v301_v24 = vpop.f32.mrb[2].mxu0 }
 0x134   :  { %540 = vst [vmem:[#allocation8 + $0x18] sm:$0xff] %v375_v11  ;;  %v302_v25 = vadd.f32 %v301_v24, %v192_v15  ;;  %v378_v26 = vpop.f32.mrb[2].mxu1  ;;  %v303_v27 = vpop.f32.mrb[3].mxu0 }
 0x135   :  { %v379_v28 = vadd.f32 %v378_v26, %v200_v16  ;;  %v304_v29 = vadd.f32 %v303_v27, %v196_v17  ;;  %v380_v30 = vpop.f32.mrb[3].mxu1 }
 0x136   :  { %541 = vst [vmem:[#allocation8 + $0x20] sm:$0xff] %v302_v25  ;;  %v381_v31 = vadd.f32 %v380_v30, %v204_v18 }
 0x137   :  { %543 = vst [vmem:[#allocation8 + $0x30] sm:$0xff] %v379_v28  ;;  %542 = vst [vmem:[#allocation8 + $0x28] sm:$0xff] %v304_v29 }
 0x138   :  { %544 = vst [vmem:[#allocation8 + $0x38] sm:$0xff] %v381_v31 }
 0x139   :  { %804 = shalt.err (!%p801_p0)
}
 0x13a   :  { %s805_s5 = scalar_lea.hbm %s971_s3, 1024 }
 0x13b   :  { %p806_p1 = scmp.ne.s32.totalorder %s971_s3, %s805_s5  ;;  %p809_p2 = scmp.lt.u32.totalorder %s805_s5, %s971_s3 }
 0x13d   :  { %p811_p3 = pnand %p809_p2, %p806_p1 }
 0x13f   :  { %814 = shalt.err (!%p811_p3)
}
 0x140   :  { %s854_s10 = smov 512   ;;  %s855_s11 = smov 32   ;;  %v207_v32 = vsub.s32 4, %v190_v8  ;;  %v215_v33 = vsub.s32 6, %v190_v8  ;;  %v211_v34 = vsub.s32 5, %v190_v8  ;;  %v219_v35 = vsub.s32 7, %v190_v8 }
 0x141   :  { %564 = dma.vmem_to_hbm [thread:$0]  %s559_s27, 1024, %s971_s3, [#allocation4], %s854_s10, %s854_s10, %s855_s11  }
 0x142   :  { %v208_v36 = vrot.slane %v187_v10, %v207_v32  ;;  %v216_v37 = vrot.slane %v187_v10, %v215_v33  ;;  %v212_v38 = vrot.slane %v187_v10, %v211_v34  ;;  %v220_v39 = vrot.slane %v187_v10, %v219_v35  ;;  %s856_s3 = smov [#allocation9]  }
 0x143   :  { %s570_s13 = sshll.u32 %s856_s3, 4  ;;  %s571_s13 = int_to_ptr.vmem [resolvable:$true] %s570_s13 }
 0x144   :  { %s815_s14 = scalar_lea.vmem %s571_s13, 1024  ;;  %p820_p5 = scmp.lt.s32.totalorder %s571_s13, %s571_s13 }
 0x145   :  { %p816_p4 = scmp.ne.s32.totalorder %s571_s13, %s815_s14  ;;  %p821_p6 = scmp.lt.s32.totalorder %s815_s14, %s815_s14 }
 0x147   :  { %p822_p7 = por %p821_p6, %p820_p5 }
 0x149   :  { %p823_p8 = pnand %p822_p7, %p816_p4 }
 0x14f   :  { %v449_v40 = vpop.f32.mrb[4].mxu0 }
 0x150   :  { %v450_v41 = vadd.f32 %v449_v40, %v208_v36  ;;  %v526_v42 = vpop.f32.mrb[4].mxu1  ;;  %v451_v43 = vpop.f32.mrb[5].mxu0 }
 0x151   :  { %v527_v44 = vadd.f32 %v526_v42, %v216_v37  ;;  %v452_v45 = vadd.f32 %v451_v43, %v212_v38  ;;  %v528_v46 = vpop.f32.mrb[5].mxu1 }
 0x152   :  { %545 = vst [vmem:[#allocation9] sm:$0xff] %v450_v41  ;;  %v529_v47 = vadd.f32 %v528_v46, %v220_v39 }
 0x153   :  { %547 = vst [vmem:[#allocation9 + $0x10] sm:$0xff] %v527_v44  ;;  %546 = vst [vmem:[#allocation9 + $0x8] sm:$0xff] %v452_v45  ;;  %v455_v49 = vpop.f32.mrb[6].mxu0 }
 0x154   :  { %548 = vst [vmem:[#allocation9 + $0x18] sm:$0xff] %v529_v47  ;;  %v456_v50 = vadd.f32 %v455_v49, %v208_v36  ;;  %v532_v51 = vpop.f32.mrb[6].mxu1  ;;  %v457_v52 = vpop.f32.mrb[7].mxu0 }
 0x155   :  { %v533_v53 = vadd.f32 %v532_v51, %v216_v37  ;;  %v458_v54 = vadd.f32 %v457_v52, %v212_v38  ;;  %v534_v55 = vpop.f32.mrb[7].mxu1 }
 0x156   :  { %549 = vst [vmem:[#allocation9 + $0x20] sm:$0xff] %v456_v50  ;;  %v535_v56 = vadd.f32 %v534_v55, %v220_v39 }
 0x157   :  { %551 = vst [vmem:[#allocation9 + $0x30] sm:$0xff] %v533_v53  ;;  %550 = vst [vmem:[#allocation9 + $0x28] sm:$0xff] %v458_v54 }
 0x158   :  { %552 = vst [vmem:[#allocation9 + $0x38] sm:$0xff] %v535_v56 }
 0x159   :  { %826 = shalt.err (!%p823_p8)
}
 0x15a   :  { %s827_s17 = scalar_lea.hbm %s972_s4, 1024 }
 0x15b   :  { %p828_p9 = scmp.ne.s32.totalorder %s972_s4, %s827_s17  ;;  %p831_p10 = scmp.lt.u32.totalorder %s827_s17, %s972_s4 }
 0x15d   :  { %p833_p11 = pnand %p831_p10, %p828_p9 }
 0x15f   :  { %836 = shalt.err (!%p833_p11)
}
 0x160   :  { %576 = dma.vmem_to_hbm [thread:$0]  %s571_s13, 1024, %s972_s4, [#allocation10], %s854_s10, %s854_s10, %s855_s11  }
 0x161   :  { %841 = dma.done.wait [#allocation4], 1024  }
 0x162   :  { %842 = vsyncadd [#allocation4], 4294966272 }
 0x163   :  { %843 = dma.done.wait [#allocation10], 1024  }
 0x164   :  { %844 = vsyncadd [#allocation10], 4294966272 }
 0x165   :  { %583 = vsyncpa [#allocation3], 1 }
 0x166   :  { %584 = vsyncpa [#allocation6], 1 }
 0x167   :  { %585 = vsyncpa [#allocation4], 1 }
 0x168   :  { %586 = vsyncpa [#allocation10], 1 }

</bundles_post_ra>
